<compile_context>
chip_gen: v7x
topology: tpu7x:2x2x1
jax: 0.10.0
libtpu: 0.0.40
codegen_flags: <defaults>
</compile_context>

<pallas_src>
import functools

import jax
import jax.numpy as jnp
from jax import lax
from jax.experimental import pallas as pl
from jax.experimental.pallas import tpu as pltpu

GAMMA = 2
IGNORE_INDEX = -100
_LANES = 128
_SUBLANES = 8


def _vmem_capacity_bytes():
    # Per-core VMEM capacity; conservative fallback (v7x has 64 MiB / TC).
    try:
        return int(pltpu.get_tpu_info().vmem_capacity_bytes)
    except Exception:
        return 64 << 20


def _choose_tile_rows(pix_rows, n_images, bytes_per_pixel, vmem_budget):
    """Rows (of 128 pixels) per block, sized from the per-chip VMEM budget."""
    if pix_rows <= _SUBLANES:
        return pix_rows                       # full-extent block (legal tiling)
    budget_rows = max(_SUBLANES, (vmem_budget // bytes_per_pixel) // _LANES)
    ts = min(budget_rows, pix_rows)
    if ts < pix_rows:
        ts = max(_SUBLANES, ts // _SUBLANES * _SUBLANES)
    # Keep >= 4 total grid blocks so v7x megacore keeps both TensorCores busy.
    while ts > _SUBLANES and n_images * ((pix_rows + ts - 1) // ts) < 4:
        ts = max(_SUBLANES, ((ts + 1) // 2) // _SUBLANES * _SUBLANES)
    return ts


def _focal_loss_kernel(x_ref, t_ref, sum_ref, cnt_ref, *, gamma, ignore_index):
    x = x_ref[...].astype(jnp.float32)        # (1, C, TS, 128) pixels on sublanes+lanes
    t = t_ref[...]                            # (1, 1, TS, 128) int32 targets
    num_classes = x.shape[1]

    # Numerically-stable log-softmax stats; the class axis is the leading axis
    # so these are C-1 vreg-wise max / add ops (no cross-lane work).
    m = jnp.max(x, axis=1, keepdims=True)                        # (1,1,TS,128)
    s = jnp.sum(jnp.exp(x - m), axis=1, keepdims=True)           # (1,1,TS,128)

    # Gather the target-class logit: select-then-add per class (no one-hot
    # cast / multiply, no full-tile iota).
    x_t = jnp.where(t == 0, x[:, 0:1], 0.0)                      # (1,1,TS,128)
    for c in range(1, num_classes):
        x_t = x_t + jnp.where(t == c, x[:, c:c + 1], 0.0)

    # Focal math on gathered per-pixel values only.
    logp_t = (x_t - m) - jnp.log(s)                              # (1,1,TS,128)
    p_t = jnp.exp(logp_t)
    one_minus = 1.0 - p_t
    if isinstance(gamma, int):
        focal_w = lax.integer_pow(one_minus, gamma)              # gamma=2 -> 1 mul
    else:
        focal_w = jnp.power(one_minus, gamma)
    loss_t = -(focal_w * logp_t)

    # Valid = not ignore_index.  Ragged / padded pixels were pre-filled with
    # ignore_index in the wrapper, so no per-step range mask is needed.  The
    # where() is a lane SELECT, so Inf/NaN from garbage logits in padded or
    # out-of-bounds rows cannot leak into the sums.
    valid = t != ignore_index
    psum = jnp.sum(jnp.where(valid, loss_t, 0.0))
    pcnt = jnp.sum(jnp.where(valid, 1.0, 0.0))

    # Lane-dense per-block partials (wrapper reads lane 0 and reduces).
    sum_ref[...] = jnp.full(sum_ref.shape, psum, dtype=jnp.float32)
    cnt_ref[...] = jnp.full(cnt_ref.shape, pcnt, dtype=jnp.float32)


def focal_loss_2d(logits, targets, *, gamma=GAMMA, ignore_index=IGNORE_INDEX,
                  tile_rows=None):
    """logits: (N, C, H, W) float; targets: (N, H, W) int. Returns scalar f32."""
    N, C, H, W = logits.shape
    P = H * W
    Pb = pl.cdiv(P, _LANES)                   # 128-pixel rows per image
    itemsize = jnp.dtype(logits.dtype).itemsize

    # --- per-chip VMEM budgeting -------------------------------------------
    vmem_cap = _vmem_capacity_bytes()
    # Leave headroom: v7x has 64 MiB / TensorCore, v5e/v6e have 128 MiB.
    vmem_budget = min(48 << 20, int(vmem_cap * 0.6))
    # Per-pixel VMEM cost: double-buffered logits+targets input blocks plus the
    # in-kernel f32 upcast / exp / select intermediates (~3x C f32 + temps).
    per_pixel = 2 * (C * itemsize + 4) + (3 * C + 8) * 4

    if tile_rows is None:
        tile_rows = _choose_tile_rows(Pb, N, per_pixel, vmem_budget)
    nblk = pl.cdiv(Pb, tile_rows)
    tile_px = tile_rows * _LANES

    # --- layout: pixels on sublanes AND lanes ------------------------------
    x = logits.reshape(N, C, P)               # dtype passed through (bf16 ok)
    if P != Pb * _LANES:
        # Rare (H*W not a multiple of 128): one extra HBM copy to pad logits.
        x = jnp.pad(x, ((0, 0), (0, 0), (0, Pb * _LANES - P)))
    x4 = x.reshape(N, C, Pb, _LANES)

    t = targets.reshape(N, P).astype(jnp.int32)
    covered_px = nblk * tile_rows * _LANES    # pixels covered by the grid
    if covered_px != P:
        # Cheap int32 pad with ignore_index: masks ragged blocks without any
        # in-kernel range check; also masks garbage logits in OOB rows.
        t = jnp.pad(t, ((0, 0), (0, covered_px - P)),
                    constant_values=ignore_index)
    t4 = t.reshape(N, 1, nblk * tile_rows, _LANES)

    # --- accurate VMEM limit (no double-counted buffering factor) ----------
    need = (2 * tile_px * (C * itemsize + 4)      # double-buffered input blocks
            + tile_px * (3 * C + 8) * 4           # f32 intermediates estimate
            + 2 * 2 * 2 * _LANES * 4              # double-buffered partial outputs
            + (4 << 20))                          # compiler margin
    vmem_limit = int(min(vmem_cap - (8 << 20), max(need, 16 << 20)))

    kernel = functools.partial(_focal_loss_kernel, gamma=gamma,
                               ignore_index=ignore_index)

    sums, cnts = pl.pallas_call(
        kernel,
        out_shape=(
            jax.ShapeDtypeStruct((N, nblk, 1, _LANES), jnp.float32),
            jax.ShapeDtypeStruct((N, nblk, 1, _LANES), jnp.float32),
        ),
        grid_spec=pltpu.PrefetchScalarGridSpec(
            num_scalar_prefetch=0,
            grid=(N, nblk),
            in_specs=[
                pl.BlockSpec((1, C, tile_rows, _LANES),
                             lambda n, j: (n, 0, j, 0)),
                pl.BlockSpec((1, 1, tile_rows, _LANES),
                             lambda n, j: (n, 0, j, 0)),
            ],
            out_specs=(
                pl.BlockSpec((1, 1, 1, _LANES), lambda n, j: (n, j, 0, 0)),
                pl.BlockSpec((1, 1, 1, _LANES), lambda n, j: (n, j, 0, 0)),
            ),
        ),
        compiler_params=pltpu.CompilerParams(
            dimension_semantics=("parallel", "parallel"),
            vmem_limit_bytes=vmem_limit),
    )(x4, t4)

    total = jnp.sum(sums[:, :, 0, 0])
    count = jnp.sum(cnts[:, :, 0, 0])
    # NOTE: if every pixel is ignored this divides by zero (NaN), matching
    # torch nll_loss(reduction='mean') semantics.
    return total / count


def _reference(logits, targets, gamma=GAMMA, ignore_index=IGNORE_INDEX):
    x = logits.astype(jnp.float32)
    logp = jax.nn.log_softmax(x, axis=1)                     # (N,C,H,W)
    p = jnp.exp(logp)
    fw = jnp.power(1.0 - p, gamma) * logp
    valid = targets != ignore_index
    t_safe = jnp.where(valid, targets, 0)
    picked = jnp.take_along_axis(fw, t_safe[:, None, :, :], axis=1)[:, 0]
    losses = jnp.where(valid, -picked, 0.0)
    return jnp.sum(losses) / jnp.sum(valid.astype(jnp.float32))


if __name__ == "__main__":
    key = jax.random.PRNGKey(0)
    k1, k2 = jax.random.split(key)

    N, C, H, W = 2, 4, 16, 16
    logits = jax.random.normal(k1, (N, C, H, W), dtype=jnp.float32)
    targets = jax.random.randint(k2, (N, H, W), 0, C, dtype=jnp.int32)
    # sprinkle a few ignored pixels
    targets = targets.at[0, 0, :4].set(IGNORE_INDEX)
    targets = targets.at[1, 5, 7].set(IGNORE_INDEX)

    loss = focal_loss_2d(logits, targets)
    loss = jax.block_until_ready(loss)

    ref = _reference(logits, targets)
    assert jnp.allclose(loss, ref, rtol=1e-5, atol=1e-6), (loss, ref)

    print("KERNEL_OK")
</pallas_src>

<mosaic_0001>
module attributes {stable_mosaic.version = 11 : i64} {
  func.func @_focal_loss_kernel(%arg0: i32, %arg1: i32, %arg2: memref<1x4x2x128xf32, #tpu.memory_space<vmem>>, %arg3: memref<1x1x2x128xi32, #tpu.memory_space<vmem>>, %arg4: memref<1x1x1x128xf32, #tpu.memory_space<vmem>>, %arg5: memref<1x1x1x128xf32, #tpu.memory_space<vmem>>) attributes {dimension_semantics = [#tpu.dimension_semantics<parallel>, #tpu.dimension_semantics<parallel>], iteration_bounds = array<i64: 2, 1>, scalar_prefetch = 0 : i64, scratch_operands = 0 : i64, tpu.core_type = #tpu.core_type<tc>, window_params = [{transform_indices = @transform_0, window_bounds = array<i64: 1, 4, 2, 128>}, {transform_indices = @transform_1, window_bounds = array<i64: 1, 1, 2, 128>}, {transform_indices = @transform_2, window_bounds = array<i64: 1, 1, 1, 128>}, {transform_indices = @transform_3, window_bounds = array<i64: 1, 1, 1, 128>}]} {
    %c0 = arith.constant 0 : index
    %c0_0 = arith.constant 0 : index
    %c0_1 = arith.constant 0 : index
    %c0_2 = arith.constant 0 : index
    %0 = vector.load %arg2[%c0, %c0_0, %c0_1, %c0_2] : memref<1x4x2x128xf32, #tpu.memory_space<vmem>>, vector<1x4x2x128xf32>
    %c0_3 = arith.constant 0 : index
    %c0_4 = arith.constant 0 : index
    %c0_5 = arith.constant 0 : index
    %c0_6 = arith.constant 0 : index
    %1 = vector.load %arg3[%c0_3, %c0_4, %c0_5, %c0_6] : memref<1x1x2x128xi32, #tpu.memory_space<vmem>>, vector<1x1x2x128xi32>
    %cst = arith.constant dense<0xFF800000> : vector<1x2x128xf32>
    %2 = vector.multi_reduction <maximumf>, %0, %cst [1] : vector<1x4x2x128xf32> to vector<1x2x128xf32>
    %3 = vector.shape_cast %2 : vector<1x2x128xf32> to vector<1x1x2x128xf32>
    %4 = vector.broadcast %3 : vector<1x1x2x128xf32> to vector<1x4x2x128xf32>
    %5 = arith.subf %0, %4 : vector<1x4x2x128xf32>
    %6 = math.exp %5 : vector<1x4x2x128xf32>
    %cst_7 = arith.constant dense<0.000000e+00> : vector<1x2x128xf32>
    %7 = vector.multi_reduction <add>, %6, %cst_7 [1] : vector<1x4x2x128xf32> to vector<1x2x128xf32>
    %8 = vector.shape_cast %7 : vector<1x2x128xf32> to vector<1x1x2x128xf32>
    %c0_i32 = arith.constant 0 : i32
    %9 = vector.broadcast %c0_i32 : i32 to vector<1x1x2x128xi32>
    %10 = arith.cmpi eq, %1, %9 : vector<1x1x2x128xi32>
    %11 = vector.extract_strided_slice %0 {offsets = [0, 0, 0, 0], sizes = [1, 1, 2, 128], strides = [1, 1, 1, 1]} : vector<1x4x2x128xf32> to vector<1x1x2x128xf32>
    %cst_8 = arith.constant 0.000000e+00 : f32
    %12 = vector.broadcast %cst_8 : f32 to vector<1x1x2x128xf32>
    %13 = arith.select %10, %11, %12 : vector<1x1x2x128xi1>, vector<1x1x2x128xf32>
    %c1_i32 = arith.constant 1 : i32
    %14 = vector.broadcast %c1_i32 : i32 to vector<1x1x2x128xi32>
    %15 = arith.cmpi eq, %1, %14 : vector<1x1x2x128xi32>
    %16 = vector.extract_strided_slice %0 {offsets = [0, 1, 0, 0], sizes = [1, 1, 2, 128], strides = [1, 1, 1, 1]} : vector<1x4x2x128xf32> to vector<1x1x2x128xf32>
    %cst_9 = arith.constant 0.000000e+00 : f32
    %17 = vector.broadcast %cst_9 : f32 to vector<1x1x2x128xf32>
    %18 = arith.select %15, %16, %17 : vector<1x1x2x128xi1>, vector<1x1x2x128xf32>
    %19 = arith.addf %13, %18 : vector<1x1x2x128xf32>
    %c2_i32 = arith.constant 2 : i32
    %20 = vector.broadcast %c2_i32 : i32 to vector<1x1x2x128xi32>
    %21 = arith.cmpi eq, %1, %20 : vector<1x1x2x128xi32>
    %22 = vector.extract_strided_slice %0 {offsets = [0, 2, 0, 0], sizes = [1, 1, 2, 128], strides = [1, 1, 1, 1]} : vector<1x4x2x128xf32> to vector<1x1x2x128xf32>
    %cst_10 = arith.constant 0.000000e+00 : f32
    %23 = vector.broadcast %cst_10 : f32 to vector<1x1x2x128xf32>
    %24 = arith.select %21, %22, %23 : vector<1x1x2x128xi1>, vector<1x1x2x128xf32>
    %25 = arith.addf %19, %24 : vector<1x1x2x128xf32>
    %c3_i32 = arith.constant 3 : i32
    %26 = vector.broadcast %c3_i32 : i32 to vector<1x1x2x128xi32>
    %27 = arith.cmpi eq, %1, %26 : vector<1x1x2x128xi32>
    %28 = vector.extract_strided_slice %0 {offsets = [0, 3, 0, 0], sizes = [1, 1, 2, 128], strides = [1, 1, 1, 1]} : vector<1x4x2x128xf32> to vector<1x1x2x128xf32>
    %cst_11 = arith.constant 0.000000e+00 : f32
    %29 = vector.broadcast %cst_11 : f32 to vector<1x1x2x128xf32>
    %30 = arith.select %27, %28, %29 : vector<1x1x2x128xi1>, vector<1x1x2x128xf32>
    %31 = arith.addf %25, %30 : vector<1x1x2x128xf32>
    %32 = arith.subf %31, %3 : vector<1x1x2x128xf32>
    %33 = math.log %8 : vector<1x1x2x128xf32>
    %34 = arith.subf %32, %33 : vector<1x1x2x128xf32>
    %35 = math.exp %34 : vector<1x1x2x128xf32>
    %cst_12 = arith.constant 1.000000e+00 : f32
    %36 = vector.broadcast %cst_12 : f32 to vector<1x1x2x128xf32>
    %37 = arith.subf %36, %35 : vector<1x1x2x128xf32>
    %38 = arith.mulf %37, %37 : vector<1x1x2x128xf32>
    %39 = arith.mulf %38, %34 : vector<1x1x2x128xf32>
    %cst_13 = arith.constant 0.000000e+00 : f32
    %40 = vector.broadcast %cst_13 : f32 to vector<1x1x2x128xf32>
    %41 = arith.subf %40, %39 : vector<1x1x2x128xf32>
    %c-100_i32 = arith.constant -100 : i32
    %42 = vector.broadcast %c-100_i32 : i32 to vector<1x1x2x128xi32>
    %43 = arith.cmpi ne, %1, %42 : vector<1x1x2x128xi32>
    %cst_14 = arith.constant 0.000000e+00 : f32
    %44 = vector.broadcast %cst_14 : f32 to vector<1x1x2x128xf32>
    %45 = arith.select %43, %41, %44 : vector<1x1x2x128xi1>, vector<1x1x2x128xf32>
    %46 = vector.shape_cast %45 : vector<1x1x2x128xf32> to vector<1x1x1x2x128xf32>
    %cst_15 = arith.constant dense<0.000000e+00> : vector<1xf32>
    %47 = vector.multi_reduction <add>, %46, %cst_15 [1, 2, 3, 4] : vector<1x1x1x2x128xf32> to vector<1xf32>
    %48 = vector.shape_cast %47 : vector<1xf32> to vector<1x1x1x1x1xf32>
    %49 = vector.extract %48[0, 0, 0, 0, 0] : f32 from vector<1x1x1x1x1xf32>
    %cst_16 = arith.constant 1.000000e+00 : f32
    %cst_17 = arith.constant 0.000000e+00 : f32
    %50 = vector.broadcast %cst_16 : f32 to vector<1x1x2x128xf32>
    %51 = vector.broadcast %cst_17 : f32 to vector<1x1x2x128xf32>
    %52 = arith.select %43, %50, %51 : vector<1x1x2x128xi1>, vector<1x1x2x128xf32>
    %53 = vector.shape_cast %52 : vector<1x1x2x128xf32> to vector<1x1x1x2x128xf32>
    %cst_18 = arith.constant dense<0.000000e+00> : vector<1xf32>
    %54 = vector.multi_reduction <add>, %53, %cst_18 [1, 2, 3, 4] : vector<1x1x1x2x128xf32> to vector<1xf32>
    %55 = vector.shape_cast %54 : vector<1xf32> to vector<1x1x1x1x1xf32>
    %56 = vector.extract %55[0, 0, 0, 0, 0] : f32 from vector<1x1x1x1x1xf32>
    %57 = vector.broadcast %49 : f32 to vector<1x1x1x128xf32>
    %c0_19 = arith.constant 0 : index
    %c0_20 = arith.constant 0 : index
    %c0_21 = arith.constant 0 : index
    %c0_22 = arith.constant 0 : index
    %58 = vector.load %arg4[%c0_19, %c0_20, %c0_21, %c0_22] : memref<1x1x1x128xf32, #tpu.memory_space<vmem>>, vector<1x1x1x128xf32>
    tpu.vector_store %arg4[%c0_19, %c0_20, %c0_21, %c0_22], %57 {strides = array<i32>} : memref<1x1x1x128xf32, #tpu.memory_space<vmem>>, vector<1x1x1x128xf32>,
    %59 = vector.broadcast %56 : f32 to vector<1x1x1x128xf32>
    %c0_23 = arith.constant 0 : index
    %c0_24 = arith.constant 0 : index
    %c0_25 = arith.constant 0 : index
    %c0_26 = arith.constant 0 : index
    %60 = vector.load %arg5[%c0_23, %c0_24, %c0_25, %c0_26] : memref<1x1x1x128xf32, #tpu.memory_space<vmem>>, vector<1x1x1x128xf32>
    tpu.vector_store %arg5[%c0_23, %c0_24, %c0_25, %c0_26], %59 {strides = array<i32>} : memref<1x1x1x128xf32, #tpu.memory_space<vmem>>, vector<1x1x1x128xf32>,
    return
  }
  func.func @transform_0(%arg0: i32, %arg1: i32) -> (i32, i32, i32, i32) {
    %c0_i32 = arith.constant 0 : i32
    %c0_i32_0 = arith.constant 0 : i32
    %c0_i32_1 = arith.constant 0 : i32
    return %arg0, %c0_i32, %arg1, %c0_i32_0 : i32, i32, i32, i32
  }
  func.func @transform_1(%arg0: i32, %arg1: i32) -> (i32, i32, i32, i32) {
    %c0_i32 = arith.constant 0 : i32
    %c0_i32_0 = arith.constant 0 : i32
    %c0_i32_1 = arith.constant 0 : i32
    return %arg0, %c0_i32, %arg1, %c0_i32_0 : i32, i32, i32, i32
  }
  func.func @transform_2(%arg0: i32, %arg1: i32) -> (i32, i32, i32, i32) {
    %c0_i32 = arith.constant 0 : i32
    %c0_i32_0 = arith.constant 0 : i32
    %c0_i32_1 = arith.constant 0 : i32
    return %arg0, %arg1, %c0_i32, %c0_i32_0 : i32, i32, i32, i32
  }
  func.func @transform_3(%arg0: i32, %arg1: i32) -> (i32, i32, i32, i32) {
    %c0_i32 = arith.constant 0 : i32
    %c0_i32_0 = arith.constant 0 : i32
    %c0_i32_1 = arith.constant 0 : i32
    return %arg0, %arg1, %c0_i32, %c0_i32_0 : i32, i32, i32, i32
  }
}

</mosaic_0001>

<bundles_post_ra>
// kernel: tpu_custom_call.1
= control target key start
LH: loop header
LB: loop body
LE: loop exit
PB: predicated region body
PF: predicated region fallthrough
CT: control target
= control target key end

     0   :  { %9 = vsyncpa [#allocation3], 0  ;;  %s1078_s0 = inlined_call_operand.hbm [shape: f32[2,4,2,128], index: 0, kind: input, shape index: {}]   ;;  %s1079_s1 = inlined_call_operand.hbm [shape: s32[2,1,2,128], index: 1, kind: input, shape index: {}]   ;;  %s1080_s2 = inlined_call_operand.hbm [shape: f32[2,1,1,128], index: 2, kind: output, shape index: {0}]   ;;  %s1081_s3 = inlined_call_operand.hbm [shape: f32[2,1,1,128], index: 3, kind: output, shape index: {1}]  }
   0x1   :  { %11 = vsyncpa [#allocation3 + $0x1], 0 }
   0x2   :  { %12 = vsyncpa [#allocation6], 0 }
   0x3   :  { %14 = vsyncpa [#allocation6 + $0x1], 0 }
   0x4   :  { %15 = vsyncpa [#allocation4], 0 }
   0x5   :  { %17 = vsyncpa [#allocation4 + $0x1], 0 }
   0x6   :  { %18 = vsyncpa [#allocation9], 0 }
   0x7   :  { %20 = vsyncpa [#allocation9 + $0x1], 0  ;;  %s814_s12 = smov 0   ;;  %s816_s13 = smov 0  }
   0x8   :  { %s818_s14 = smov 0   ;;  %s820_s15 = smov 0  }
   0x9   :  { %s822_s16 = smov 0   ;;  %s824_s17 = smov 0  }
   0xa LB: > { %s499_s18 = sadd.s32 4294967295, %s785_s17   ;;  %s500_s19 = sadd.s32 4294967294, %s785_s17   ;;  %s785_s17 = sphi %s824_s17, %s26_s17   ;;  %s781_s16 = sphi %s822_s16, %s1100_s16   ;;  %s777_s15 = sphi %s820_s15, %s1099_s15   ;;  %s773_s14 = sphi %s818_s14, %s1098_s14   ;;  %s769_s13 = sphi %s816_s13, %s1097_s13   ;;  %s765_s12 = sphi %s814_s12, %s1096_s12  }
   0xb   : > { %s38_s20 = sadd.s32 1, %s781_s16  ;;  %s47_s21 = sadd.s32 1, %s773_s14 }
   0xc   : > { %p40_p0 = scmp.ge.s32.totalorder %s38_s20, 2  ;;  %p54_p1 = scmp.ne.s32.totalorder %s773_s14, %s769_s13 }
   0xd   : > { %p55_p2 = scmp.eq.s32.totalorder %s785_s17, 0  ;;  %p60_p3 = scmp.ne.s32.totalorder %s769_s13, %s765_s12 }
   0xe   : > { %s1102_s20 = smov (%p40_p0, %s38_s20), 0  ;;  %p61_p5 = scmp.eq.s32.totalorder %s499_s18, 0 }
   0xf   : > { %p855_p4 = por %p55_p2, %p54_p1  ;;  %s42_s23 = ssub.s32 %s781_s16, %s1102_s20 }
  0x10   : > { %p114_p6 = scmp.eq.s32.totalorder %s499_s18, 1  ;;  %p45_p7 = scmp.eq.s32.totalorder %s42_s23, 0 }
  0x11   : > { %p861_p8 = por %p61_p5, %p60_p3  ;;  %p120_p10 = scmp.eq.s32.totalorder %s500_s19, 1 }
  0x12   : > { %p865_p9 = por %p114_p6, %p54_p1  ;;  %p542_p13 = scmp.lt.s32.totalorder %s785_s17, 2 }
  0x13   : > { %s1085_s24 = scalar_select %p861_p8, 1, 0 }
  0x14   : > { %s1086_s25 = scalar_select %p865_p9, 1, 0 }
  0x15   : > { %s870_s26 = scalar_select %p45_p7, %s773_s14, %s47_s21  }
  0x16   : > { %p872_p11 = por %p120_p10, %p60_p3  ;;  %s879_s28 = sand.u32 1, %s773_s14  }
  0x17   : > { %s503_s29 = sshll.u32 %s879_s28, 3  ;;  %s515_s30 = sshll.u32 %s781_s16, 7 }
  0x18   : > { %s1087_s27 = scalar_select %p872_p11, 1, 0 }
  0x19   : > { %s886_s6 = scalar_lea.hbm %s1078_s0, %s515_s30  ;;  %s172_s7 = scalar_lea.vmem [#allocation2], %s503_s29 }
  0x1a   : > { %s180_s8 = sshll.u32 %s172_s7, 4  ;;  %p892_p0 = pnand %p542_p13, %p855_p4  ;;  %s888_s8 = int_to_ptr.vmem [resolvable:$true] %s180_s8 }
  0x1b   : > { %s169_s10 = scalar_lea.sflag [#allocation3], %s879_s28  ;;  %s607_s11 = scalar_lea.hbm %s886_s6, 128 }
  0x1c   : > { %p608_p2 = scmp.ne.s32.totalorder %s886_s6, %s607_s11  ;;  %p609_p3 = pneg %p892_p0 }
  0x1d   : > { %s612_s21 = scalar_lea.hbm %s1078_s0, 256  ;;  %p613_p4 = scmp.lt.u32.totalorder %s886_s6, %s1078_s0 }
  0x1e   : > { %p610_p5 = pnand %p609_p3, %p608_p2  ;;  %p614_p7 = scmp.lt.u32.totalorder %s612_s21, %s607_s11 }
  0x1f   : > { %p616_p13 = scmp.lt.u32.totalorder %s607_s11, %s886_s6 }
  0x20   : > { %p611_p6 = pneg %p610_p5  ;;  %p615_p10 = por %p614_p7, %p613_p4 }
  0x22   : > { %p617_p12 = por %p616_p13, %p615_p10 }
  0x24   : > { %p618_p1 = pnand %p617_p12, %p611_p6 }
  0x26   : > { %621 = shalt.err (!%p618_p1)
}
  0x27   : > { %s622_s29 = scalar_lea.vmem %s888_s8, 128  ;;  %s787_s30 = smov [#allocation2]  }
  0x28   : > { %p623_p2 = scmp.ne.s32.totalorder %s888_s8, %s622_s29  ;;  %s627_s4 = sshll.u32 %s787_s30, 4  ;;  %s628_s4 = int_to_ptr.vmem [resolvable:$false] %s627_s4 }
  0x29   : > { %s629_s5 = scalar_lea.vmem %s628_s4, 256  ;;  %p630_p9 = scmp.lt.s32.totalorder %s888_s8, %s628_s4 }
  0x2a   : > { %p625_p5 = pnand %p623_p2, %p609_p3  ;;  %p631_p4 = scmp.lt.s32.totalorder %s629_s5, %s622_s29 }
  0x2c   : > { %p626_p11 = pneg %p625_p5  ;;  %p632_p7 = por %p631_p4, %p630_p9 }
  0x2e   : > { %p633_p10 = pnand %p632_p7, %p626_p11 }
  0x30   : > { %636 = shalt.err (!%p633_p10)
}
  0x31   : > { %s788_s7 = smov 32   ;;  %s789_s11 = smov 2  }
  0x32   : > { %531 = dma.hbm_to_vmem [thread:$0]  (!%p892_p0), %s886_s6, 128, %s888_s8, %s169_s10, %s788_s7, %s788_s7, %s789_s11  }
  0x33   : > { %p207_p12 = scmp.lt.s32.totalorder %s785_s17, 3  ;;  %s506_s18 = sshll.u32 %s879_s28, 1 }
  0x34   : > { %s507_s19 = sshll.u32 %s781_s16, 5  ;;  %p1089_p9 = scmp.ge.s32.totalorder %s785_s17, 1 }
  0x35   : > { %s937_s29 = scalar_lea.hbm %s1079_s1, %s507_s19  ;;  %s194_s30 = scalar_lea.vmem [#allocation5], %s506_s18 }
  0x36   : > { %p930_p11 = pnand %p1089_p9, %p207_p12  ;;  %s202_s4 = sshll.u32 %s194_s30, 4  ;;  %s203_s4 = int_to_ptr.vmem [resolvable:$true] %s202_s4 }
  0x37   : > { %s191_s6 = scalar_lea.sflag [#allocation6], %s879_s28  ;;  %s637_s8 = scalar_lea.hbm %s937_s29, 32 }
  0x38   : > { %s1090_s21 = scalar_select %p930_p11, 1, 0 }
  0x39   : > { %p638_p1 = scmp.ne.s32.totalorder %s937_s29, %s637_s8  ;;  %s642_s7 = scalar_lea.hbm %s1079_s1, 64 }
  0x3a   : > { %p643_p2 = scmp.lt.u32.totalorder %s937_s29, %s1079_s1  ;;  %p644_p5 = scmp.lt.u32.totalorder %s642_s7, %s637_s8 }
  0x3b   : > { %p640_p6 = pnand %p638_p1, %p609_p3  ;;  %p646_p7 = scmp.lt.u32.totalorder %s637_s8, %s937_s29 }
  0x3c   : > { %p645_p4 = por %p644_p5, %p643_p2 }
  0x3d   : > { %p641_p13 = pneg %p640_p6 }
  0x3e   : > { %p647_p10 = por %p646_p7, %p645_p4 }
  0x40   : > { %p648_p12 = pnand %p647_p10, %p641_p13 }
  0x42   : > { %651 = shalt.err (!%p648_p12)
}
  0x43   : > { %s652_s28 = scalar_lea.vmem %s203_s4, 32  ;;  %s790_s18 = smov [#allocation5]  }
  0x44   : > { %p653_p9 = scmp.ne.s32.totalorder %s203_s4, %s652_s28  ;;  %s657_s22 = sshll.u32 %s790_s18, 4  ;;  %s658_s22 = int_to_ptr.vmem [resolvable:$false] %s657_s22 }
  0x45   : > { %s659_s23 = scalar_lea.vmem %s658_s22, 64  ;;  %p660_p8 = scmp.lt.s32.totalorder %s203_s4, %s658_s22 }
  0x46   : > { %p655_p1 = pnand %p653_p9, %p609_p3  ;;  %p661_p11 = scmp.lt.s32.totalorder %s659_s23, %s652_s28 }
  0x48   : > { %p656_p6 = pneg %p655_p1  ;;  %p662_p2 = por %p661_p11, %p660_p8 }
  0x4a   : > { %p663_p5 = pnand %p662_p2, %p656_p6 }
  0x4c   : > { %666 = shalt.err (!%p663_p5)
}
  0x4d   : > { %534 = dma.hbm_to_vmem [thread:$0]  (!%p892_p0), %s937_s29, 32, %s203_s4, %s191_s6  }
  0x4e   : > { %p1091_p13 = scmp.ne.s32.totalorder %s1090_s21, 0 }
  0x4f   : > { %s962_s30 = sand.u32 (!%p1091_p13), 1, %s769_s13   ;;  %p1092_p3 = scmp.ne.s32.totalorder (!%p1091_p13), %s1085_s24, 0 }
  0x50   : > { %211 = sbr.rel (%p1091_p13) target bundleno = 402 (0x192), region = 28  ;;  %s509_s8 = sshll.u32 (!%p1091_p13), %s962_s30, 3 }
  0x51   : > { %s214_s10 = scalar_lea.sflag (!%p1091_p13), [#allocation3], %s962_s30  ;;  %s217_s5 = scalar_lea.vmem (!%p1091_p13), [#allocation2], %s509_s8 }
  0x57   : > { %748 = dma.done.wait (%p1092_p3), %s214_s10, 128  }
  0x58   : > { %750 = vsyncadd (%p1092_p3), %s214_s10, 4294967168  ;;  %s510_s9 = sshll.u32 %s962_s30, 1  ;;  %s223_s21 = scalar_lea.sflag [#allocation6], %s962_s30 }
  0x59   : > { %s226_s29 = scalar_lea.vmem [#allocation5], %s510_s9 }
  0x5a   : > { %752 = dma.done.wait (%p1092_p3), %s223_s21, 32  }
  0x5b   : > { %754 = vsyncadd (%p1092_p3), %s223_s21, 4294967264  ;;  %vm262_vm0 = vcmask 1041408   ;;  %v257_v0 = vld [vmem:[%s217_s5] sm:$0x3]  ;;  %v258_v1 = vld [vmem:[%s217_s5 + $0x2] sm:$0x3] }
  0x5c   : > { %v259_v2 = vld [vmem:[%s217_s5 + $0x4] sm:$0x3]  ;;  %v260_v3 = vld [vmem:[%s217_s5 + $0x6] sm:$0x3]  ;;  %v263_v4 = vsel %vm262_vm0, %v257_v0, -inf  ;;  %v264_v5 = vsel %vm262_vm0, %v258_v1, -inf }
  0x5d   : > { %v265_v6 = vsel %vm262_vm0, %v259_v2, -inf  ;;  %v266_v7 = vsel %vm262_vm0, %v260_v3, -inf  ;;  %v267_v8 = vmax.f32 %v263_v4, %v264_v5  ;;  %v261_v19 = vld [vmem:[%s226_s29] sm:$0x3]  ;;  %v791_v49 = vmov 0.0   ;;  %s511_s24 = sshll.u32 %s777_s15, 4 }
  0x5e   : > { %v268_v9 = vmax.f32 %v265_v6, %v266_v7  ;;  %vm289_vm1 = vcmp.eq.s32.totalorder %v261_v19, 0  ;;  %vm291_vm2 = vcmp.eq.s32.totalorder %v261_v19, 1  ;;  %vm294_vm3 = vcmp.eq.s32.totalorder %v261_v19, 2  ;;  %s250_s4 = scalar_lea.vmem [#allocation7], %s962_s30  ;;  %s256_s7 = scalar_lea.vmem [#allocation8], %s962_s30 }
  0x5f   : > { %v290_v28 = vsel %vm289_vm1, %v257_v0, 0.0  ;;  %v292_v29 = vsel %vm291_vm2, %v258_v1, 0.0  ;;  %v295_v34 = vsel %vm294_vm3, %v259_v2, 0.0  ;;  %vm297_vm4 = vcmp.eq.s32.totalorder %v261_v19, 3  ;;  %s355_s6 = sshll.u32 %s250_s4, 4  ;;  %s369_s11 = sshll.u32 %s256_s7, 4  ;;  %s998_s6 = int_to_ptr.vmem [resolvable:$true] %s355_s6  ;;  %s1000_s11 = int_to_ptr.vmem [resolvable:$true] %s369_s11 }
  0x60   : > { %v269_v10 = vmax.f32 %v267_v8, %v268_v9  ;;  %v293_v32 = vadd.f32 %v292_v29, %v290_v28  ;;  %v298_v36 = vsel %vm297_vm4, %v260_v3, 0.0  ;;  %vm310_vm5 = vcmp.ne.s32.totalorder %v261_v19, 4294967196  ;;  %s996_s18 = scalar_lea.hbm %s1080_s2, %s511_s24  ;;  %s338_s23 = scalar_lea.sflag [#allocation4], %s962_s30 }
  0x61   : > { %v322_v50 = vsel %vm310_vm5, 1.0, %v791_v49  ;;  %s667_s8 = scalar_lea.vmem %s998_s6, 16  ;;  %p1093_p0 = scmp.ne.s32.totalorder %s1086_s25, 0 }
  0x62   : > { %v270_v11 = vsub.f32 %v257_v0, %v269_v10  ;;  %v271_v12 = vsub.f32 %v258_v1, %v269_v10  ;;  %v272_v13 = vsub.f32 %v259_v2, %v269_v10  ;;  %v273_v14 = vsub.f32 %v260_v3, %v269_v10  ;;  %p668_p8 = scmp.ne.s32.totalorder %s998_s6, %s667_s8  ;;  %s792_s10 = smov [#allocation7]  }
  0x63   : > { %v296_v35 = vadd.f32 %v295_v34, %v293_v32  ;;  %v323_v52 = vsel %vm262_vm0, %v322_v50, 0.0  ;;  %s671_s5 = sshll.u32 %s792_s10, 4  ;;  %s672_s5 = int_to_ptr.vmem [resolvable:$false] %s671_s5 }
  0x64   : > { %v274_v15 = vmul.f32 1.442695, %v270_v11  ;;  %v276_v16 = vmul.f32 1.442695, %v271_v12  ;;  %v278_v17 = vmul.f32 1.442695, %v272_v13  ;;  %p669_p11 = pnand %p668_p8, %p1093_p0  ;;  %p674_p7 = scmp.lt.s32.totalorder %s998_s6, %s672_s5 }
  0x65   : > { %v280_v18 = vmul.f32 1.442695, %v273_v14  ;;  %v299_v37 = vadd.f32 %v298_v36, %v296_v35  ;;  %s673_s9 = scalar_lea.vmem %s672_s5, 32 }
  0x66   : > { %595 = vpow2.f32 %v274_v15  ;;  %p670_p4 = pneg %p669_p11  ;;  %p675_p10 = scmp.lt.s32.totalorder %s673_s9, %s667_s8 }
  0x67   : > { %597 = vpow2.f32 %v276_v16  ;;  %v300_v38 = vsub.f32 %v299_v37, %v269_v10 }
  0x68   : > { %599 = vpow2.f32 %v278_v17  ;;  %p676_p12 = por %p675_p10, %p674_p7 }
  0x69   : > { %601 = vpow2.f32 %v280_v18 }
  0x6a   : > { %p677_p9 = pnand %p676_p12, %p670_p4 }
  0x70   : > { %v596_v20 = vpop.eup %595 }
  0x71   : > { %v598_v21 = vpop.eup %597  ;;  %v282_v22 = vsel %vm262_vm0, %v596_v20, 0.0 }
  0x72   : > { %v600_v23 = vpop.eup %599  ;;  %v283_v24 = vsel %vm262_vm0, %v598_v21, 0.0 }
  0x73   : > { %v602_v25 = vpop.eup %601  ;;  %v284_v26 = vadd.f32 %v283_v24, %v282_v22  ;;  %v285_v27 = vsel %vm262_vm0, %v600_v23, 0.0 }
  0x74   : > { %v287_v30 = vsel %vm262_vm0, %v602_v25, 0.0 }
  0x75   : > { %v286_v31 = vadd.f32 %v285_v27, %v284_v26 }
  0x77   : > { %v288_v33 = vadd.f32 %v287_v30, %v286_v31 }
  0x79   : > { %603 = vlog2.f32 %v288_v33 }
  0x83   : > { %v604_v39 = vpop.eup %603 }
  0x84   : > { %v302_v40 = vmul.f32 0.6931472, %v604_v39 }
  0x86   : > { %v303_v41 = vsub.f32 %v300_v38, %v302_v40 }
  0x88   : > { %v304_v42 = vmul.f32 1.442695, %v303_v41 }
  0x8a   : > { %605 = vpow2.f32 %v304_v42 }
  0x94   : > { %v606_v43 = vpop.eup %605 }
  0x95   : > { %v306_v44 = vsub.f32 1.0, %v606_v43 }
  0x97   : > { %v307_v45 = vmul.f32 %v306_v44, %v306_v44 }
  0x99   : > { %v308_v46 = vmul.f32 %v307_v45, %v303_v41 }
  0x9b   : > { %v309_v47 = vsub.f32 0.0, %v308_v46 }
  0x9d   : > { %v311_v48 = vsel %vm310_vm5, %v309_v47, 0.0 }
  0x9e   : > { %v312_v51 = vsel %vm262_vm0, %v311_v48, 0.0 }
  0x9f   : > { %313 = vadd.xlane.f32.xlu0 %v312_v51 }
  0xa3   : > { %324 = vadd.xlane.f32.xlu0 %v323_v52 }
 0x12c   : > { %v314_v53 = vpop.xlane.xlu0 %313 }
 0x12d   : > { %v315_v54 = vrot.slane %v314_v53, 4 }
 0x12f   : > { %v316_v55 = vadd.f32 %v315_v54, %v314_v53 }
 0x130   : > { %v325_v56 = vpop.xlane.xlu0 %324 }
 0x131   : > { %v317_v57 = vrot.slane %v316_v55, 2  ;;  %v326_v58 = vrot.slane %v325_v56, 4 }
 0x133   : > { %v327_v59 = vadd.f32 %v326_v58, %v325_v56  ;;  %v318_v60 = vadd.f32 %v317_v57, %v316_v55 }
 0x135   : > { %v328_v61 = vrot.slane %v327_v59, 2  ;;  %v319_v62 = vrot.slane %v318_v60, 1 }
 0x137   : > { %v329_v63 = vadd.f32 %v328_v61, %v327_v59  ;;  %v320_v0 = vadd.f32 %v319_v62, %v318_v60 }
 0x139   : > { %516 = vpush %v320_v0  ;;  %v330_v1 = vrot.slane %v329_v63, 1 }
 0x13b   : > { %v331_v2 = vadd.f32 %v330_v1, %v329_v63 }
 0x13d   : > { %518 = vpush %v331_v2 }
 0x16a   : > { %s517_s22 = spop %516 }
 0x16b   : > { %v333_v3 = vstv %s517_s22 }
 0x16c   : > { %334 = vst [vmem:[%s250_s4] sm:$0x1] %v333_v3 }
 0x16d   : > { %680 = shalt.err (!%p677_p9)
}
 0x16e   : > { %s681_s21 = scalar_lea.hbm %s996_s18, 16  ;;  %s685_s19 = scalar_lea.hbm %s1080_s2, 32 }
 0x16f   : > { %p682_p1 = scmp.ne.s32.totalorder %s996_s18, %s681_s21  ;;  %p686_p5 = scmp.lt.u32.totalorder %s996_s18, %s1080_s2 }
 0x170   : > { %p687_p13 = scmp.lt.u32.totalorder %s685_s19, %s681_s21  ;;  %p689_p8 = scmp.lt.u32.totalorder %s681_s21, %s996_s18 }
 0x171   : > { %p683_p6 = pnand %p682_p1, %p1093_p0 }
 0x172   : > { %p688_p3 = por %p687_p13, %p686_p5 }
 0x173   : > { %p684_p2 = pneg %p683_p6 }
 0x174   : > { %p690_p11 = por %p689_p8, %p688_p3 }
 0x176   : > { %p691_p4 = pnand %p690_p11, %p684_p2 }
 0x178   : > { %694 = shalt.err (!%p691_p4)
}
 0x179   : > { %524 = dma.vmem_to_hbm [thread:$0]  (%p1093_p0), %s998_s6, 16, %s996_s18, %s338_s23  }
 0x17a   : > { %s519_s8 = spop %518  ;;  %s1029_s9 = scalar_lea.hbm %s1081_s3, %s511_s24 }
 0x17b   : > { %v335_v4 = vstv %s519_s8  ;;  %s342_s21 = scalar_lea.sflag [#allocation9], %s962_s30  ;;  %s695_s29 = scalar_lea.vmem %s1000_s11, 16 }
 0x17c   : > { %336 = vst [vmem:[%s256_s7] sm:$0x1] %v335_v4  ;;  %p696_p7 = scmp.ne.s32.totalorder %s1000_s11, %s695_s29  ;;  %s793_s4 = smov [#allocation8]  }
 0x17d   : > { %s699_s19 = sshll.u32 %s793_s4, 4  ;;  %s700_s19 = int_to_ptr.vmem [resolvable:$false] %s699_s19 }
 0x17e   : > { %p697_p10 = pnand %p696_p7, %p1093_p0  ;;  %s701_s6 = scalar_lea.vmem %s700_s19, 32 }
 0x17f   : > { %p702_p9 = scmp.lt.s32.totalorder %s1000_s11, %s700_s19  ;;  %p703_p1 = scmp.lt.s32.totalorder %s701_s6, %s695_s29 }
 0x180   : > { %p698_p12 = pneg %p697_p10 }
 0x181   : > { %p704_p6 = por %p703_p1, %p702_p9 }
 0x183   : > { %p705_p2 = pnand %p704_p6, %p698_p12 }
 0x185   : > { %708 = shalt.err (!%p705_p2)
}
 0x186   : > { %s709_s15 = scalar_lea.hbm %s1029_s9, 16  ;;  %s713_s7 = scalar_lea.hbm %s1081_s3, 32 }
 0x187   : > { %p710_p5 = scmp.ne.s32.totalorder %s1029_s9, %s709_s15  ;;  %p714_p8 = scmp.lt.u32.totalorder %s1029_s9, %s1081_s3 }
 0x188   : > { %p715_p11 = scmp.lt.u32.totalorder %s713_s7, %s709_s15  ;;  %p717_p7 = scmp.lt.u32.totalorder %s709_s15, %s1029_s9 }
 0x189   : > { %p711_p13 = pnand %p710_p5, %p1093_p0 }
 0x18a   : > { %p716_p4 = por %p715_p11, %p714_p8 }
 0x18b   : > { %p712_p3 = pneg %p711_p13 }
 0x18c   : > { %p718_p10 = por %p717_p7, %p716_p4 }
 0x18e   : > { %p719_p12 = pnand %p718_p10, %p712_p3 }
 0x190   : > { %722 = shalt.err (!%p719_p12)
}
 0x191   : > { %525 = dma.vmem_to_hbm [thread:$0]  (%p1093_p0), %s1000_s11, 16, %s1029_s9, %s342_s21  }
 0x192 PF: > { %s381_s28 = sand.u32 1, %s765_s12   ;;  %p1094_p9 = scmp.ne.s32.totalorder %s1087_s27, 0 }
 0x193   : > { %p1095_p1 = scmp.ge.s32.totalorder %s785_s17, 2  ;;  %s382_s22 = scalar_lea.sflag [#allocation4], %s381_s28 }
 0x195   : > { %p536_p6 = pnand %p1095_p1, %p1094_p9 }
 0x197   : > { %756 = dma.done.wait (!%p536_p6), %s382_s22, 16  }
 0x198   : > { %758 = vsyncadd (!%p536_p6), %s382_s22, 4294967280  ;;  %s390_s8 = scalar_lea.sflag [#allocation9], %s381_s28 }
 0x199   : > { %760 = dma.done.wait (!%p536_p6), %s390_s8, 16  }
 0x19a   : > { %762 = vsyncadd (!%p536_p6), %s390_s8, 4294967280  ;;  %s26_s17 = sadd.s32 1, %s785_s17   ;;  %s1096_s12 = smov %s769_s13 }
 0x19b   : > { %p23_p2 = scmp.ge.s32.totalorder %s26_s17, 4   ;;  %s1097_s13 = smov %s773_s14 }
 0x19c   : > { %s1098_s14 = smov %s870_s26  ;;  %s1099_s15 = smov %s781_s16 }
 0x19d   : > { %s1100_s16 = smov %s1102_s20  ;;  %25 = sbr.rel (!%p23_p2) target bundleno = 10 (0xa), region = 103 }
 0x1a4   :  { %394 = vsyncpa [#allocation3], 1 }
 0x1a5   :  { %396 = vsyncpa [#allocation3 + $0x1], 1 }
 0x1a6   :  { %397 = vsyncpa [#allocation6], 1 }
 0x1a7   :  { %399 = vsyncpa [#allocation6 + $0x1], 1 }
 0x1a8   :  { %400 = vsyncpa [#allocation4], 1 }
 0x1a9   :  { %402 = vsyncpa [#allocation4 + $0x1], 1 }
 0x1aa   :  { %403 = vsyncpa [#allocation9], 1 }
 0x1ab   :  { %405 = vsyncpa [#allocation9 + $0x1], 1 }

</bundles_post_ra>
